<compile_context>
chip_gen: v7x
topology: tpu7x:2x2x1
jax: 0.10.0
libtpu: 0.0.40
codegen_flags: <defaults>
</compile_context>

<pallas_src>
import jax
import jax.numpy as jnp
from jax.experimental import pallas as pl
from jax.experimental.pallas import tpu as pltpu


def _interp_matrix(n_in, n_out):
    """Bilinear interpolation matrix A (n_out, n_in), align_corners=True."""
    p = jnp.arange(n_out, dtype=jnp.float32)
    src = p * (n_in - 1) / (n_out - 1)
    i0 = jnp.clip(jnp.floor(src).astype(jnp.int32), 0, n_in - 2)
    w1 = src - i0.astype(jnp.float32)
    w0 = 1.0 - w1
    rows = jnp.arange(n_out)
    A = jnp.zeros((n_out, n_in), jnp.float32)
    A = A.at[rows, i0].add(w0)
    A = A.at[rows, i0 + 1].add(w1)
    return A


def _psp_upsample_kernel(x_ref, a_ref, mm_ref, alpha_ref, o_ref, y_scr):
    # x_ref     : (Nb, H, WCp)       bf16  Nb batch elems, channels-last; lane WC is
    #                                      the 1.0 "bias" lane, remaining lanes 0-pad
    # a_ref     : (H2, 3*H)          f32   [A0 | A1 | A2] row-interp, dy shift baked in
    # mm_ref    : (1, WCp, 3*W2Ct)   bf16  col-interp*conv matrices for this W2C tile,
    #                                      taps concatenated along lanes; conv bias is
    #                                      folded into row WC of the dy=1 block
    # alpha_ref : (1,)               f32   PReLU slope (SMEM scalar)
    # o_ref     : (Nb, H2, W2Ct)     bf16
    # y_scr     : (Nb, 3*H, W2Ct)    f32   stage-1 results, re-stacked per tap
    nb, h, wcp = x_ref.shape
    w2ct = o_ref.shape[2]

    # Stage 1: one big MXU GEMM over all Nb batch rows and all three taps.
    x2 = x_ref[...].reshape(nb * h, wcp)                  # free relayout (H % 16 == 0)
    y = jnp.dot(x2, mm_ref[0], preferred_element_type=jnp.float32)   # (Nb*H, 3*W2Ct)

    # Re-stack the three tap lane-blocks along sublanes (aligned block stores).
    y = y.reshape(nb, h, 3 * w2ct)
    for dy in range(3):
        y_scr[:, dy * h:(dy + 1) * h, :] = y[:, :, dy * w2ct:(dy + 1) * w2ct]

    # Stage 2: tiny-K row-interp GEMM per batch element, kept in f32, then PReLU.
    a = a_ref[...]                                        # (H2, 3*H) f32
    alpha = alpha_ref[0]                                  # shared PReLU slope
    for b in range(nb):
        acc = jnp.dot(a, y_scr[b], preferred_element_type=jnp.float32)   # (H2, W2Ct)
        o_ref[b] = jnp.where(acc > 0, acc, alpha * acc).astype(o_ref.dtype)


def psp_upsample_nhwc(x_nhwc, conv_w, conv_b, prelu_alpha, *,
                      nb=None, w2c_tile=None, out_dtype=jnp.bfloat16):
    """PSPUpsample forward. x_nhwc: (N, H, W, Cin) -> (N, 2H, 2W, Cout) in out_dtype."""
    N, H, W, Cin = x_nhwc.shape
    Cout = conv_w.shape[0]
    H2, W2 = 2 * H, 2 * W
    WC = W * Cin
    W2C = W2 * Cout
    # K dim: real data + one "ones" lane (folded bias), rounded up to the lane width.
    WCp = ((WC + 1 + 127) // 128) * 128

    # ---- batch-group / output-tile sizing -----------------------------------------
    if nb is None:
        nb = max(1, min(N, 256 // H if H <= 256 else 1))      # M = nb*H ~ 128-256 rows
    Np = ((N + nb - 1) // nb) * nb
    if w2c_tile is None:
        w2c_tile = W2C
        if W2C % 128 == 0:
            budget = 4 << 20                                   # bf16 bytes per mm tile
            w2c_tile, t = 128, 128
            while t <= W2C:
                if W2C % t == 0 and WCp * 3 * t * 2 <= budget:
                    w2c_tile = t
                t += 128
    assert W2C % w2c_tile == 0
    n_wt = W2C // w2c_tile

    # ---- exact host-side folds (plain JAX, computed once) --------------------------
    ah = _interp_matrix(H, H2)                                         # (H2, H)
    ah_pad = jnp.pad(ah, ((1, 1), (0, 0)))                             # (H2+2, H)
    a_cat = jnp.concatenate([ah_pad[dy:dy + H2] for dy in range(3)],
                            axis=1)                                    # (H2, 3H) f32

    aw = _interp_matrix(W, W2)                                         # (W2, W)
    bw = jnp.kron(aw.T, jnp.eye(Cin, dtype=jnp.float32))               # (WC, W2*Cin)
    bw_pad = jnp.pad(bw, ((0, 0), (Cin, Cin)))                         # (WC, (W2+2)*Cin)
    w_hwio = jnp.transpose(conv_w, (2, 3, 1, 0)).astype(jnp.float32)   # (3,3,Cin,Cout)
    bias_full = jnp.tile(conv_b.astype(jnp.float32), (W2,))            # (W2C,)

    mm_full = []
    for dy in range(3):
        m_dy = sum(jnp.kron(jnp.eye(W2 + 2, W2, k=-dx, dtype=jnp.float32),
                            w_hwio[dy, dx]) for dx in range(3))        # ((W2+2)*Cin, W2C)
        blk = jnp.zeros((WCp, W2C), jnp.float32)
        blk = blk.at[:WC].set(bw_pad @ m_dy)                           # fold col-interp
        if dy == 1:
            blk = blk.at[WC].set(bias_full)                            # folded conv bias
        mm_full.append(blk)
    # (n_wt, WCp, 3*w2c_tile): the three taps interleaved per W2C tile.
    mm_tiled = (jnp.stack(mm_full)                                     # (3, WCp, W2C)
                .reshape(3, WCp, n_wt, w2c_tile)
                .transpose(2, 1, 0, 3)
                .reshape(n_wt, WCp, 3 * w2c_tile)
                .astype(jnp.bfloat16))

    alpha = jnp.asarray(prelu_alpha, jnp.float32).reshape(1,)
    # TODO(synk): nn.PReLU(num_parameters=Cout) (per-channel slopes) would need a
    # (W2C,)-tiled slope vector instead of this single shared SMEM scalar.

    # x: channels-last, flattened W*Cin, ones lane for the bias, lane pad, batch pad.
    x_flat = x_nhwc.reshape(N, H, WC).astype(jnp.float32)
    x_flat = jnp.concatenate([x_flat, jnp.ones((N, H, 1), jnp.float32)], axis=-1)
    x_flat = jnp.pad(x_flat, ((0, Np - N), (0, 0), (0, WCp - WC - 1)))
    x_bf = x_flat.astype(jnp.bfloat16)

    out_flat = pl.pallas_call(
        _psp_upsample_kernel,
        out_shape=jax.ShapeDtypeStruct((Np, H2, W2C), out_dtype),
        grid_spec=pltpu.PrefetchScalarGridSpec(
            num_scalar_prefetch=0,
            grid=(Np // nb, n_wt),
            in_specs=[
                pl.BlockSpec((nb, H, WCp), lambda i, j: (i, 0, 0)),
                # grid-invariant constant -> single-buffered
                pl.BlockSpec((H2, 3 * H), lambda i, j: (0, 0),
                             pipeline_mode=pl.Buffered(1)),
                # weight tile changes along the inner axis -> default double-buffering
                pl.BlockSpec((1, WCp, 3 * w2c_tile), lambda i, j: (j, 0, 0)),
                pl.BlockSpec(memory_space=pltpu.MemorySpace.SMEM),
            ],
            out_specs=pl.BlockSpec((nb, H2, w2c_tile), lambda i, j: (i, 0, j)),
            scratch_shapes=[pltpu.VMEM((nb, 3 * H, w2c_tile), jnp.float32)],
        ),
        compiler_params=pltpu.CompilerParams(
            dimension_semantics=("parallel", "parallel"),
            vmem_limit_bytes=48 * 1024 * 1024,   # fits v7x's 64 MiB; raise on v5e/v6e
        ),
    )(x_bf, a_cat, mm_tiled, alpha)

    return out_flat[:N].reshape(N, H2, W2, Cout)


def psp_upsample(x_nchw, conv_w, conv_b, prelu_alpha, **kwargs):
    """NCHW/f32 compatibility wrapper matching the PyTorch module's layout."""
    x_nhwc = jnp.transpose(x_nchw, (0, 2, 3, 1))
    out = psp_upsample_nhwc(x_nhwc, conv_w, conv_b, prelu_alpha, **kwargs)
    return jnp.transpose(out, (0, 3, 1, 2)).astype(x_nchw.dtype)


def _reference(x_nchw, conv_w, conv_b, prelu_alpha):
    """Pure-JAX f32 reference (same semantics as the PyTorch module)."""
    ah = _interp_matrix(x_nchw.shape[2], 2 * x_nchw.shape[2])
    aw = _interp_matrix(x_nchw.shape[3], 2 * x_nchw.shape[3])
    up = jnp.einsum('ph,nchw,qw->ncpq', ah, x_nchw.astype(jnp.float32), aw)
    out = jax.lax.conv_general_dilated(
        up, conv_w.astype(jnp.float32), window_strides=(1, 1),
        padding=((1, 1), (1, 1)),
        dimension_numbers=('NCHW', 'OIHW', 'NCHW'))
    out = out + conv_b.astype(jnp.float32)[None, :, None, None]
    return jnp.where(out > 0, out, prelu_alpha * out)


if __name__ == "__main__":
    N, Cin, Cout, H, W = 8, 4, 8, 16, 16

    key = jax.random.PRNGKey(0)
    kx, kw, kb = jax.random.split(key, 3)
    x = jax.random.normal(kx, (N, Cin, H, W), jnp.float32)
    conv_w = jax.random.normal(kw, (Cout, Cin, 3, 3), jnp.float32) * 0.1
    conv_b = jax.random.normal(kb, (Cout,), jnp.float32) * 0.1
    prelu_alpha = 0.25  # nn.PReLU() default: single shared slope, init 0.25

    # w2c_tile=128 -> grid=(N//Nb, 2): exercises the second parallel axis.
    out = psp_upsample(x, conv_w, conv_b, prelu_alpha, w2c_tile=128)
    out = jax.block_until_ready(out)

    ref = _reference(x, conv_w, conv_b, prelu_alpha)
    assert out.shape == (N, Cout, 2 * H, 2 * W), out.shape
    max_err = float(jnp.max(jnp.abs(out.astype(jnp.float32) - ref)))
    # bf16 MXU operands + bf16 output -> loosened tolerance vs pure f32.
    assert jnp.allclose(out.astype(jnp.float32), ref, atol=5e-2, rtol=5e-2), max_err

    print("KERNEL_OK")
</pallas_src>

<mosaic_0001>
module attributes {stable_mosaic.version = 11 : i64} {
  func.func @_psp_upsample_kernel(%arg0: i32, %arg1: i32, %arg2: memref<8x16x128xbf16, #tpu.memory_space<vmem>>, %arg3: memref<32x48xf32, #tpu.memory_space<vmem>>, %arg4: memref<1x128x384xbf16, #tpu.memory_space<vmem>>, %arg5: memref<1xf32, #tpu.memory_space<smem>>, %arg6: memref<8x32x128xbf16, #tpu.memory_space<vmem>>, %arg7: memref<8x48x128xf32, #tpu.memory_space<vmem>>) attributes {dimension_semantics = [#tpu.dimension_semantics<parallel>, #tpu.dimension_semantics<parallel>], iteration_bounds = array<i64: 1, 2>, scalar_prefetch = 0 : i64, scratch_operands = 1 : i64, tpu.core_type = #tpu.core_type<tc>, window_params = [{transform_indices = @transform_0, window_bounds = array<i64: 8, 16, 128>}, {pipeline_mode = #tpu.pipeline_mode<synchronous>, transform_indices = @transform_1, window_bounds = array<i64: 32, 48>}, {transform_indices = @transform_2, window_bounds = array<i64: 1, 128, 384>}, {transform_indices = @transform_3, window_bounds = array<i64: 1>}, {transform_indices = @transform_4, window_bounds = array<i64: 8, 32, 128>}]} {
    %c0 = arith.constant 0 : index
    %c0_0 = arith.constant 0 : index
    %c0_1 = arith.constant 0 : index
    %0 = vector.load %arg2[%c0, %c0_0, %c0_1] : memref<8x16x128xbf16, #tpu.memory_space<vmem>>, vector<8x16x128xbf16>
    %1 = vector.shape_cast %0 : vector<8x16x128xbf16> to vector<128x128xbf16>
    %c0_2 = arith.constant 0 : index
    %c0_3 = arith.constant 0 : index
    %c0_4 = arith.constant 0 : index
    %2 = vector.load %arg4[%c0_2, %c0_3, %c0_4] : memref<1x128x384xbf16, #tpu.memory_space<vmem>>, vector<1x128x384xbf16>
    %3 = vector.shape_cast %2 : vector<1x128x384xbf16> to vector<128x384xbf16>
    %cst = arith.constant dense<0.000000e+00> : vector<128x384xf32>
    %4 = tpu.matmul %1, %3, %cst {dimension_numbers = #tpu.dot_dimension_numbers<[1], [0], [0], [1], [0, 0, 1, 1], [], []>} : vector<128x128xbf16>, vector<128x384xbf16>, vector<128x384xf32> -> vector<128x384xf32>
    %5 = vector.shape_cast %4 : vector<128x384xf32> to vector<8x16x384xf32>
    %6 = vector.extract_strided_slice %5 {offsets = [0, 0, 0], sizes = [8, 16, 128], strides = [1, 1, 1]} : vector<8x16x384xf32> to vector<8x16x128xf32>
    %c0_5 = arith.constant 0 : index
    %c0_6 = arith.constant 0 : index
    %c0_7 = arith.constant 0 : index
    %7 = vector.load %arg7[%c0_5, %c0_6, %c0_7] : memref<8x48x128xf32, #tpu.memory_space<vmem>>, vector<8x16x128xf32>
    tpu.vector_store %arg7[%c0_5, %c0_6, %c0_7], %6 {strides = array<i32>} : memref<8x48x128xf32, #tpu.memory_space<vmem>>, vector<8x16x128xf32>,
    %8 = vector.extract_strided_slice %5 {offsets = [0, 0, 128], sizes = [8, 16, 128], strides = [1, 1, 1]} : vector<8x16x384xf32> to vector<8x16x128xf32>
    %c0_8 = arith.constant 0 : index
    %c16 = arith.constant 16 : index
    %c0_9 = arith.constant 0 : index
    %9 = vector.load %arg7[%c0_8, %c16, %c0_9] : memref<8x48x128xf32, #tpu.memory_space<vmem>>, vector<8x16x128xf32>
    tpu.vector_store %arg7[%c0_8, %c16, %c0_9], %8 {strides = array<i32>} : memref<8x48x128xf32, #tpu.memory_space<vmem>>, vector<8x16x128xf32>,
    %10 = vector.extract_strided_slice %5 {offsets = [0, 0, 256], sizes = [8, 16, 128], strides = [1, 1, 1]} : vector<8x16x384xf32> to vector<8x16x128xf32>
    %c0_10 = arith.constant 0 : index
    %c32 = arith.constant 32 : index
    %c0_11 = arith.constant 0 : index
    %11 = vector.load %arg7[%c0_10, %c32, %c0_11] : memref<8x48x128xf32, #tpu.memory_space<vmem>>, vector<8x16x128xf32>
    tpu.vector_store %arg7[%c0_10, %c32, %c0_11], %10 {strides = array<i32>} : memref<8x48x128xf32, #tpu.memory_space<vmem>>, vector<8x16x128xf32>,
    %c0_12 = arith.constant 0 : index
    %c0_13 = arith.constant 0 : index
    %12 = vector.load %arg3[%c0_12, %c0_13] : memref<32x48xf32, #tpu.memory_space<vmem>>, vector<32x48xf32>
    %c0_14 = arith.constant 0 : index
    %13 = memref.load %arg5[%c0_14] : memref<1xf32, #tpu.memory_space<smem>>
    %c0_15 = arith.constant 0 : index
    %c0_16 = arith.constant 0 : index
    %c0_17 = arith.constant 0 : index
    %14 = vector.load %arg7[%c0_15, %c0_16, %c0_17] : memref<8x48x128xf32, #tpu.memory_space<vmem>>, vector<1x48x128xf32>
    %15 = vector.shape_cast %14 : vector<1x48x128xf32> to vector<48x128xf32>
    %cst_18 = arith.constant dense<0.000000e+00> : vector<32x128xf32>
    %16 = tpu.matmul %12, %15, %cst_18 {dimension_numbers = #tpu.dot_dimension_numbers<[1], [0], [0], [1], [0, 0, 1, 1], [], []>} : vector<32x48xf32>, vector<48x128xf32>, vector<32x128xf32> -> vector<32x128xf32>
    %cst_19 = arith.constant 0.000000e+00 : f32
    %17 = vector.broadcast %cst_19 : f32 to vector<32x128xf32>
    %18 = arith.cmpf ogt, %16, %17 : vector<32x128xf32>
    %19 = vector.broadcast %13 : f32 to vector<32x128xf32>
    %20 = arith.mulf %19, %16 : vector<32x128xf32>
    %21 = arith.select %18, %16, %20 : vector<32x128xi1>, vector<32x128xf32>
    %22 = arith.truncf %21 : vector<32x128xf32> to vector<32x128xbf16>
    %c0_20 = arith.constant 0 : index
    %c0_21 = arith.constant 0 : index
    %c0_22 = arith.constant 0 : index
    %23 = vector.load %arg6[%c0_20, %c0_21, %c0_22] : memref<8x32x128xbf16, #tpu.memory_space<vmem>>, vector<1x32x128xbf16>
    %24 = vector.shape_cast %23 : vector<1x32x128xbf16> to vector<32x128xbf16>
    %25 = vector.shape_cast %22 : vector<32x128xbf16> to vector<1x32x128xbf16>
    tpu.vector_store %arg6[%c0_20, %c0_21, %c0_22], %25 {strides = array<i32>} : memref<8x32x128xbf16, #tpu.memory_space<vmem>>, vector<1x32x128xbf16>,
    %c1 = arith.constant 1 : index
    %c0_23 = arith.constant 0 : index
    %c0_24 = arith.constant 0 : index
    %26 = vector.load %arg7[%c1, %c0_23, %c0_24] : memref<8x48x128xf32, #tpu.memory_space<vmem>>, vector<1x48x128xf32>
    %27 = vector.shape_cast %26 : vector<1x48x128xf32> to vector<48x128xf32>
    %cst_25 = arith.constant dense<0.000000e+00> : vector<32x128xf32>
    %28 = tpu.matmul %12, %27, %cst_25 {dimension_numbers = #tpu.dot_dimension_numbers<[1], [0], [0], [1], [0, 0, 1, 1], [], []>} : vector<32x48xf32>, vector<48x128xf32>, vector<32x128xf32> -> vector<32x128xf32>
    %cst_26 = arith.constant 0.000000e+00 : f32
    %29 = vector.broadcast %cst_26 : f32 to vector<32x128xf32>
    %30 = arith.cmpf ogt, %28, %29 : vector<32x128xf32>
    %31 = vector.broadcast %13 : f32 to vector<32x128xf32>
    %32 = arith.mulf %31, %28 : vector<32x128xf32>
    %33 = arith.select %30, %28, %32 : vector<32x128xi1>, vector<32x128xf32>
    %34 = arith.truncf %33 : vector<32x128xf32> to vector<32x128xbf16>
    %c1_27 = arith.constant 1 : index
    %c0_28 = arith.constant 0 : index
    %c0_29 = arith.constant 0 : index
    %35 = vector.load %arg6[%c1_27, %c0_28, %c0_29] : memref<8x32x128xbf16, #tpu.memory_space<vmem>>, vector<1x32x128xbf16>
    %36 = vector.shape_cast %35 : vector<1x32x128xbf16> to vector<32x128xbf16>
    %37 = vector.shape_cast %34 : vector<32x128xbf16> to vector<1x32x128xbf16>
    tpu.vector_store %arg6[%c1_27, %c0_28, %c0_29], %37 {strides = array<i32>} : memref<8x32x128xbf16, #tpu.memory_space<vmem>>, vector<1x32x128xbf16>,
    %c2 = arith.constant 2 : index
    %c0_30 = arith.constant 0 : index
    %c0_31 = arith.constant 0 : index
    %38 = vector.load %arg7[%c2, %c0_30, %c0_31] : memref<8x48x128xf32, #tpu.memory_space<vmem>>, vector<1x48x128xf32>
    %39 = vector.shape_cast %38 : vector<1x48x128xf32> to vector<48x128xf32>
    %cst_32 = arith.constant dense<0.000000e+00> : vector<32x128xf32>
    %40 = tpu.matmul %12, %39, %cst_32 {dimension_numbers = #tpu.dot_dimension_numbers<[1], [0], [0], [1], [0, 0, 1, 1], [], []>} : vector<32x48xf32>, vector<48x128xf32>, vector<32x128xf32> -> vector<32x128xf32>
    %cst_33 = arith.constant 0.000000e+00 : f32
    %41 = vector.broadcast %cst_33 : f32 to vector<32x128xf32>
    %42 = arith.cmpf ogt, %40, %41 : vector<32x128xf32>
    %43 = vector.broadcast %13 : f32 to vector<32x128xf32>
    %44 = arith.mulf %43, %40 : vector<32x128xf32>
    %45 = arith.select %42, %40, %44 : vector<32x128xi1>, vector<32x128xf32>
    %46 = arith.truncf %45 : vector<32x128xf32> to vector<32x128xbf16>
    %c2_34 = arith.constant 2 : index
    %c0_35 = arith.constant 0 : index
    %c0_36 = arith.constant 0 : index
    %47 = vector.load %arg6[%c2_34, %c0_35, %c0_36] : memref<8x32x128xbf16, #tpu.memory_space<vmem>>, vector<1x32x128xbf16>
    %48 = vector.shape_cast %47 : vector<1x32x128xbf16> to vector<32x128xbf16>
    %49 = vector.shape_cast %46 : vector<32x128xbf16> to vector<1x32x128xbf16>
    tpu.vector_store %arg6[%c2_34, %c0_35, %c0_36], %49 {strides = array<i32>} : memref<8x32x128xbf16, #tpu.memory_space<vmem>>, vector<1x32x128xbf16>,
    %c3 = arith.constant 3 : index
    %c0_37 = arith.constant 0 : index
    %c0_38 = arith.constant 0 : index
    %50 = vector.load %arg7[%c3, %c0_37, %c0_38] : memref<8x48x128xf32, #tpu.memory_space<vmem>>, vector<1x48x128xf32>
    %51 = vector.shape_cast %50 : vector<1x48x128xf32> to vector<48x128xf32>
    %cst_39 = arith.constant dense<0.000000e+00> : vector<32x128xf32>
    %52 = tpu.matmul %12, %51, %cst_39 {dimension_numbers = #tpu.dot_dimension_numbers<[1], [0], [0], [1], [0, 0, 1, 1], [], []>} : vector<32x48xf32>, vector<48x128xf32>, vector<32x128xf32> -> vector<32x128xf32>
    %cst_40 = arith.constant 0.000000e+00 : f32
    %53 = vector.broadcast %cst_40 : f32 to vector<32x128xf32>
    %54 = arith.cmpf ogt, %52, %53 : vector<32x128xf32>
    %55 = vector.broadcast %13 : f32 to vector<32x128xf32>
    %56 = arith.mulf %55, %52 : vector<32x128xf32>
    %57 = arith.select %54, %52, %56 : vector<32x128xi1>, vector<32x128xf32>
    %58 = arith.truncf %57 : vector<32x128xf32> to vector<32x128xbf16>
    %c3_41 = arith.constant 3 : index
    %c0_42 = arith.constant 0 : index
    %c0_43 = arith.constant 0 : index
    %59 = vector.load %arg6[%c3_41, %c0_42, %c0_43] : memref<8x32x128xbf16, #tpu.memory_space<vmem>>, vector<1x32x128xbf16>
    %60 = vector.shape_cast %59 : vector<1x32x128xbf16> to vector<32x128xbf16>
    %61 = vector.shape_cast %58 : vector<32x128xbf16> to vector<1x32x128xbf16>
    tpu.vector_store %arg6[%c3_41, %c0_42, %c0_43], %61 {strides = array<i32>} : memref<8x32x128xbf16, #tpu.memory_space<vmem>>, vector<1x32x128xbf16>,
    %c4 = arith.constant 4 : index
    %c0_44 = arith.constant 0 : index
    %c0_45 = arith.constant 0 : index
    %62 = vector.load %arg7[%c4, %c0_44, %c0_45] : memref<8x48x128xf32, #tpu.memory_space<vmem>>, vector<1x48x128xf32>
    %63 = vector.shape_cast %62 : vector<1x48x128xf32> to vector<48x128xf32>
    %cst_46 = arith.constant dense<0.000000e+00> : vector<32x128xf32>
    %64 = tpu.matmul %12, %63, %cst_46 {dimension_numbers = #tpu.dot_dimension_numbers<[1], [0], [0], [1], [0, 0, 1, 1], [], []>} : vector<32x48xf32>, vector<48x128xf32>, vector<32x128xf32> -> vector<32x128xf32>
    %cst_47 = arith.constant 0.000000e+00 : f32
    %65 = vector.broadcast %cst_47 : f32 to vector<32x128xf32>
    %66 = arith.cmpf ogt, %64, %65 : vector<32x128xf32>
    %67 = vector.broadcast %13 : f32 to vector<32x128xf32>
    %68 = arith.mulf %67, %64 : vector<32x128xf32>
    %69 = arith.select %66, %64, %68 : vector<32x128xi1>, vector<32x128xf32>
    %70 = arith.truncf %69 : vector<32x128xf32> to vector<32x128xbf16>
    %c4_48 = arith.constant 4 : index
    %c0_49 = arith.constant 0 : index
    %c0_50 = arith.constant 0 : index
    %71 = vector.load %arg6[%c4_48, %c0_49, %c0_50] : memref<8x32x128xbf16, #tpu.memory_space<vmem>>, vector<1x32x128xbf16>
    %72 = vector.shape_cast %71 : vector<1x32x128xbf16> to vector<32x128xbf16>
    %73 = vector.shape_cast %70 : vector<32x128xbf16> to vector<1x32x128xbf16>
    tpu.vector_store %arg6[%c4_48, %c0_49, %c0_50], %73 {strides = array<i32>} : memref<8x32x128xbf16, #tpu.memory_space<vmem>>, vector<1x32x128xbf16>,
    %c5 = arith.constant 5 : index
    %c0_51 = arith.constant 0 : index
    %c0_52 = arith.constant 0 : index
    %74 = vector.load %arg7[%c5, %c0_51, %c0_52] : memref<8x48x128xf32, #tpu.memory_space<vmem>>, vector<1x48x128xf32>
    %75 = vector.shape_cast %74 : vector<1x48x128xf32> to vector<48x128xf32>
    %cst_53 = arith.constant dense<0.000000e+00> : vector<32x128xf32>
    %76 = tpu.matmul %12, %75, %cst_53 {dimension_numbers = #tpu.dot_dimension_numbers<[1], [0], [0], [1], [0, 0, 1, 1], [], []>} : vector<32x48xf32>, vector<48x128xf32>, vector<32x128xf32> -> vector<32x128xf32>
    %cst_54 = arith.constant 0.000000e+00 : f32
    %77 = vector.broadcast %cst_54 : f32 to vector<32x128xf32>
    %78 = arith.cmpf ogt, %76, %77 : vector<32x128xf32>
    %79 = vector.broadcast %13 : f32 to vector<32x128xf32>
    %80 = arith.mulf %79, %76 : vector<32x128xf32>
    %81 = arith.select %78, %76, %80 : vector<32x128xi1>, vector<32x128xf32>
    %82 = arith.truncf %81 : vector<32x128xf32> to vector<32x128xbf16>
    %c5_55 = arith.constant 5 : index
    %c0_56 = arith.constant 0 : index
    %c0_57 = arith.constant 0 : index
    %83 = vector.load %arg6[%c5_55, %c0_56, %c0_57] : memref<8x32x128xbf16, #tpu.memory_space<vmem>>, vector<1x32x128xbf16>
    %84 = vector.shape_cast %83 : vector<1x32x128xbf16> to vector<32x128xbf16>
    %85 = vector.shape_cast %82 : vector<32x128xbf16> to vector<1x32x128xbf16>
    tpu.vector_store %arg6[%c5_55, %c0_56, %c0_57], %85 {strides = array<i32>} : memref<8x32x128xbf16, #tpu.memory_space<vmem>>, vector<1x32x128xbf16>,
    %c6 = arith.constant 6 : index
    %c0_58 = arith.constant 0 : index
    %c0_59 = arith.constant 0 : index
    %86 = vector.load %arg7[%c6, %c0_58, %c0_59] : memref<8x48x128xf32, #tpu.memory_space<vmem>>, vector<1x48x128xf32>
    %87 = vector.shape_cast %86 : vector<1x48x128xf32> to vector<48x128xf32>
    %cst_60 = arith.constant dense<0.000000e+00> : vector<32x128xf32>
    %88 = tpu.matmul %12, %87, %cst_60 {dimension_numbers = #tpu.dot_dimension_numbers<[1], [0], [0], [1], [0, 0, 1, 1], [], []>} : vector<32x48xf32>, vector<48x128xf32>, vector<32x128xf32> -> vector<32x128xf32>
    %cst_61 = arith.constant 0.000000e+00 : f32
    %89 = vector.broadcast %cst_61 : f32 to vector<32x128xf32>
    %90 = arith.cmpf ogt, %88, %89 : vector<32x128xf32>
    %91 = vector.broadcast %13 : f32 to vector<32x128xf32>
    %92 = arith.mulf %91, %88 : vector<32x128xf32>
    %93 = arith.select %90, %88, %92 : vector<32x128xi1>, vector<32x128xf32>
    %94 = arith.truncf %93 : vector<32x128xf32> to vector<32x128xbf16>
    %c6_62 = arith.constant 6 : index
    %c0_63 = arith.constant 0 : index
    %c0_64 = arith.constant 0 : index
    %95 = vector.load %arg6[%c6_62, %c0_63, %c0_64] : memref<8x32x128xbf16, #tpu.memory_space<vmem>>, vector<1x32x128xbf16>
    %96 = vector.shape_cast %95 : vector<1x32x128xbf16> to vector<32x128xbf16>
    %97 = vector.shape_cast %94 : vector<32x128xbf16> to vector<1x32x128xbf16>
    tpu.vector_store %arg6[%c6_62, %c0_63, %c0_64], %97 {strides = array<i32>} : memref<8x32x128xbf16, #tpu.memory_space<vmem>>, vector<1x32x128xbf16>,
    %c7 = arith.constant 7 : index
    %c0_65 = arith.constant 0 : index
    %c0_66 = arith.constant 0 : index
    %98 = vector.load %arg7[%c7, %c0_65, %c0_66] : memref<8x48x128xf32, #tpu.memory_space<vmem>>, vector<1x48x128xf32>
    %99 = vector.shape_cast %98 : vector<1x48x128xf32> to vector<48x128xf32>
    %cst_67 = arith.constant dense<0.000000e+00> : vector<32x128xf32>
    %100 = tpu.matmul %12, %99, %cst_67 {dimension_numbers = #tpu.dot_dimension_numbers<[1], [0], [0], [1], [0, 0, 1, 1], [], []>} : vector<32x48xf32>, vector<48x128xf32>, vector<32x128xf32> -> vector<32x128xf32>
    %cst_68 = arith.constant 0.000000e+00 : f32
    %101 = vector.broadcast %cst_68 : f32 to vector<32x128xf32>
    %102 = arith.cmpf ogt, %100, %101 : vector<32x128xf32>
    %103 = vector.broadcast %13 : f32 to vector<32x128xf32>
    %104 = arith.mulf %103, %100 : vector<32x128xf32>
    %105 = arith.select %102, %100, %104 : vector<32x128xi1>, vector<32x128xf32>
    %106 = arith.truncf %105 : vector<32x128xf32> to vector<32x128xbf16>
    %c7_69 = arith.constant 7 : index
    %c0_70 = arith.constant 0 : index
    %c0_71 = arith.constant 0 : index
    %107 = vector.load %arg6[%c7_69, %c0_70, %c0_71] : memref<8x32x128xbf16, #tpu.memory_space<vmem>>, vector<1x32x128xbf16>
    %108 = vector.shape_cast %107 : vector<1x32x128xbf16> to vector<32x128xbf16>
    %109 = vector.shape_cast %106 : vector<32x128xbf16> to vector<1x32x128xbf16>
    tpu.vector_store %arg6[%c7_69, %c0_70, %c0_71], %109 {strides = array<i32>} : memref<8x32x128xbf16, #tpu.memory_space<vmem>>, vector<1x32x128xbf16>,
    return
  }
  func.func @transform_0(%arg0: i32, %arg1: i32) -> (i32, i32, i32) {
    %c0_i32 = arith.constant 0 : i32
    %c0_i32_0 = arith.constant 0 : i32
    %c0_i32_1 = arith.constant 0 : i32
    return %arg0, %c0_i32, %c0_i32_0 : i32, i32, i32
  }
  func.func @transform_1(%arg0: i32, %arg1: i32) -> (i32, i32) {
    %c0_i32 = arith.constant 0 : i32
    %c0_i32_0 = arith.constant 0 : i32
    %c0_i32_1 = arith.constant 0 : i32
    return %c0_i32, %c0_i32_0 : i32, i32
  }
  func.func @transform_2(%arg0: i32, %arg1: i32) -> (i32, i32, i32) {
    %c0_i32 = arith.constant 0 : i32
    %c0_i32_0 = arith.constant 0 : i32
    %c0_i32_1 = arith.constant 0 : i32
    return %arg1, %c0_i32, %c0_i32_0 : i32, i32, i32
  }
  func.func @transform_3(%arg0: i32, %arg1: i32) -> i32 {
    %c0_i32 = arith.constant 0 : i32
    %c0_i32_0 = arith.constant 0 : i32
    return %c0_i32 : i32
  }
  func.func @transform_4(%arg0: i32, %arg1: i32) -> (i32, i32, i32) {
    %c0_i32 = arith.constant 0 : i32
    %c0_i32_0 = arith.constant 0 : i32
    return %arg0, %c0_i32, %arg1 : i32, i32, i32
  }
}

</mosaic_0001>

<bundles_post_ra>
// kernel: tpu_custom_call.1
= control target key start
LH: loop header
LB: loop body
LE: loop exit
PB: predicated region body
PF: predicated region fallthrough
CT: control target
= control target key end

     0   :  { %s3311_s0 = inlined_call_operand.hbm [shape: bf16[8,16,128], index: 0, kind: input, shape index: {}]   ;;  %s3312_s1 = inlined_call_operand.hbm [shape: f32[32,48], index: 1, kind: input, shape index: {}]   ;;  %s3313_s2 = inlined_call_operand.hbm [shape: bf16[2,128,384], index: 2, kind: input, shape index: {}]   ;;  %s3314_s3 = inlined_call_operand.<no memory space> [shape: f32[1], index: 3, kind: input, shape index: {}]   ;;  %s3315_s4 = inlined_call_operand.hbm [shape: bf16[8,32,256], index: 4, kind: output, shape index: {}]  }
   0x1   :  { %9 = sst [smem:[#allocation3]] %s3314_s3 }
   0x2   :  { %10 = vsyncpa [#allocation5], 0 }
   0x3   :  { %11 = vsyncpa [#allocation8], 0 }
   0x4   :  { %12 = vsyncpa [#allocation6], 0 }
   0x5   :  { %14 = vsyncpa [#allocation6 + $0x1], 0  ;;  %s2879_s17 = smov 0   ;;  %s2881_s18 = smov 0  }
   0x6   :  { %s2883_s19 = smov 0   ;;  %s2885_s20 = smov 0  }
   0x7   :  { %s2887_s21 = smov 0   ;;  %s2889_s22 = smov 0  }
   0x8 LB: > { %s2910_s3 = sadd.s32 4294967295, %s2835_s22   ;;  %s1890_s23 = sadd.s32 4294967294, %s2835_s22   ;;  %s2835_s22 = sphi %s2889_s22, %s20_s22   ;;  %s2831_s21 = sphi %s2887_s21, %s3338_s21   ;;  %s2827_s20 = sphi %s2885_s20, %s3337_s20   ;;  %s2823_s19 = sphi %s2883_s19, %s3336_s19   ;;  %s2819_s18 = sphi %s2881_s18, %s3335_s18   ;;  %s2815_s17 = sphi %s2879_s17, %s3334_s17  }
   0x9   : > { %s86_s24 = sadd.s32 1, %s2823_s19  ;;  %p93_p0 = scmp.ne.s32.totalorder %s2823_s19, %s2819_s18 }
   0xa   : > { %p94_p1 = scmp.eq.s32.totalorder %s2835_s22, 0  ;;  %p99_p2 = scmp.ne.s32.totalorder %s2819_s18, %s2815_s17 }
   0xb   : > { %p3316_p3 = scmp.eq.s32.totalorder %s2910_s3, 0  ;;  %p146_p4 = scmp.eq.s32.totalorder %s2910_s3, 1 }
   0xc   : > { %p2921_p5 = por %p94_p1, %p93_p0  ;;  %p152_p6 = scmp.eq.s32.totalorder %s1890_s23, 1 }
   0xd   : > { %p2927_p7 = por %p3316_p3, %p99_p2  ;;  %p2931_p8 = por %p146_p4, %p93_p0 }
   0xe   : > { %p2935_p9 = por %p152_p6, %p99_p2  ;;  %p1891_p10 = scmp.ge.s32.totalorder %s2835_s22, 1 }
   0xf   : > { %s3320_s26 = scalar_select %p2927_p7, 1, 0 }
  0x10   : > { %s3321_s27 = scalar_select %p2931_p8, 1, 0 }
  0x11   : > { %s3322_s28 = scalar_select %p2935_p9, 1, 0 }
  0x12   : > { %p159_p11 = scmp.lt.s32.totalorder %s2835_s22, 3  ;;  %s2837_s30 = smov [#allocation4]  }
  0x13   : > { %s175_s5 = sshll.u32 %s2837_s30, 4  ;;  %p2555_p1 = scmp.lt.s32.totalorder %s2835_s22, 2  ;;  %s2945_s5 = int_to_ptr.vmem [resolvable:$true] %s175_s5 }
  0x14   : > { %p2941_p12 = pnand %p1891_p10, %p159_p11  ;;  %s2838_s7 = smov [#allocation7]  }
  0x15   : > { %s188_s8 = sshll.u32 %s2838_s7, 4  ;;  %p2959_p4 = pnand %p2555_p1, %p2921_p5  ;;  %s2963_s8 = int_to_ptr.vmem [resolvable:$true] %s188_s8 }
  0x16   : > { %p2538_p13 = pneg %p2941_p12  ;;  %s2659_s12 = scalar_lea.hbm %s3311_s0, 1024 }
  0x17   : > { %p2660_p6 = scmp.ne.s32.totalorder %s3311_s0, %s2659_s12  ;;  %p2666_p5 = scmp.lt.u32.totalorder %s2659_s12, %s3311_s0 }
  0x18   : > { %p2953_p2 = pnand %p2538_p13, %p3316_p3 }
  0x1a   : > { %p2661_p10 = pneg %p2953_p2 }
  0x1c   : > { %p2662_p11 = pnand %p2661_p10, %p2660_p6 }
  0x1e   : > { %p2663_p13 = pneg %p2662_p11 }
  0x20   : > { %p2668_p1 = pnand %p2666_p5, %p2663_p13 }
  0x22   : > { %2671 = shalt.err (!%p2668_p1)
}
  0x23   : > { %s2672_s23 = scalar_lea.vmem %s2945_s5, 1024  ;;  %p2680_p8 = scmp.lt.s32.totalorder %s2945_s5, %s2945_s5 }
  0x24   : > { %p2673_p0 = scmp.ne.s32.totalorder %s2945_s5, %s2672_s23  ;;  %p2681_p6 = scmp.lt.s32.totalorder %s2672_s23, %s2672_s23 }
  0x26   : > { %p2675_p3 = pnand %p2673_p0, %p2661_p10  ;;  %p2682_p11 = por %p2681_p6, %p2680_p8 }
  0x28   : > { %p2676_p9 = pneg %p2675_p3 }
  0x2a   : > { %p2683_p7 = pnand %p2682_p11, %p2676_p9 }
  0x2c   : > { %2686 = shalt.err (!%p2683_p7)
}
  0x2d   : > { %s2839_s25 = smov 64   ;;  %s2840_s30 = smov 4  }
  0x2e   : > { %2541 = dma.hbm_to_vmem [thread:$0]  (!%p2953_p2), %s3311_s0, 1024, %s2945_s5, [#allocation5], %s2839_s25, %s2839_s25, %s2840_s30  }
  0x2f   : > { %s2687_s13 = scalar_lea.hbm %s3312_s1, 512 }
  0x30   : > { %p2688_p3 = scmp.ne.s32.totalorder %s3312_s1, %s2687_s13  ;;  %p2694_p9 = scmp.lt.u32.totalorder %s2687_s13, %s3312_s1 }
  0x32   : > { %p2690_p7 = pnand %p2688_p3, %p2661_p10 }
  0x34   : > { %p2691_p8 = pneg %p2690_p7 }
  0x36   : > { %p2696_p0 = pnand %p2694_p9, %p2691_p8 }
  0x38   : > { %2699 = shalt.err (!%p2696_p0)
}
  0x39   : > { %s2700_s5 = scalar_lea.vmem %s2963_s8, 512  ;;  %p2708_p6 = scmp.lt.s32.totalorder %s2963_s8, %s2963_s8 }
  0x3a   : > { %p2701_p13 = scmp.ne.s32.totalorder %s2963_s8, %s2700_s5  ;;  %p2709_p11 = scmp.lt.s32.totalorder %s2700_s5, %s2700_s5 }
  0x3c   : > { %p2703_p5 = pnand %p2701_p13, %p2661_p10  ;;  %p2710_p3 = por %p2709_p11, %p2708_p6 }
  0x3e   : > { %p2704_p1 = pneg %p2703_p5 }
  0x40   : > { %p2711_p7 = pnand %p2710_p3, %p2704_p1 }
  0x42   : > { %2714 = shalt.err (!%p2711_p7)
}
  0x43   : > { %s2841_s25 = smov 128   ;;  %s2842_s30 = smov 8  }
  0x44   : > { %2544 = dma.hbm_to_vmem [thread:$0]  (!%p2953_p2), %s3312_s1, 512, %s2963_s8, [#allocation8], %s2841_s25, %s2841_s25, %s2842_s30  }
  0x45   : > { %s205_s11 = sand.u32 1, %s2835_s22   ;;  %s29_s12 = sadd.s32 1, %s2831_s21 }
  0x46   : > { %s207_s13 = sand.u32 1, %s2823_s19   ;;  %p30_p10 = scmp.ge.s32.totalorder %s29_s12, 2 }
  0x47   : > { %s2523_s14 = smul.u32 192, %s207_s13  ;;  %s3037_s7 = scalar_lea.sflag [#allocation5], %s205_s11 }
  0x48   : > { %s2524_s15 = smul.u32 3072, %s2831_s21  ;;  %s3340_s12 = smov (%p30_p10, %s29_s12), 0 }
  0x49   : > { %s83_s6 = ssub.s32 %s2831_s21, %s3340_s12  ;;  %s209_s8 = scalar_lea.vmem [#allocation9], %s2523_s14 }
  0x4a   : > { %s3026_s5 = scalar_lea.hbm %s3313_s2, %s2524_s15  ;;  %s216_s25 = sshll.u32 %s209_s8, 4  ;;  %s3030_s25 = int_to_ptr.vmem [resolvable:$true] %s216_s25 }
  0x4b   : > { %p84_p2 = scmp.eq.s32.totalorder %s83_s6, 0  ;;  %s2715_s10 = scalar_lea.hbm %s3026_s5, 3072 }
  0x4c   : > { %p2716_p8 = scmp.ne.s32.totalorder %s3026_s5, %s2715_s10  ;;  %p2717_p9 = pneg %p2959_p4 }
  0x4d   : > { %s3035_s30 = scalar_select %p84_p2, %s2823_s19, %s86_s24  }
  0x4e   : > { %p2718_p0 = pnand %p2717_p9, %p2716_p8  ;;  %s2720_s14 = scalar_lea.hbm %s3313_s2, 6144 }
  0x4f   : > { %p2721_p5 = scmp.lt.u32.totalorder %s3026_s5, %s3313_s2  ;;  %p2722_p1 = scmp.lt.u32.totalorder %s2720_s14, %s2715_s10 }
  0x50   : > { %p2719_p13 = pneg %p2718_p0  ;;  %p2724_p11 = scmp.lt.u32.totalorder %s2715_s10, %s3026_s5 }
  0x51   : > { %p2723_p6 = por %p2722_p1, %p2721_p5 }
  0x53   : > { %p2725_p3 = por %p2724_p11, %p2723_p6 }
  0x55   : > { %p2726_p7 = pnand %p2725_p3, %p2719_p13 }
  0x57   : > { %2729 = shalt.err (!%p2726_p7)
}
  0x58   : > { %s2730_s24 = scalar_lea.vmem %s3030_s25, 3072  ;;  %s2843_s11 = smov [#allocation9]  }
  0x59   : > { %p2731_p10 = scmp.ne.s32.totalorder %s3030_s25, %s2730_s24  ;;  %s2735_s6 = sshll.u32 %s2843_s11, 4  ;;  %s2736_s6 = int_to_ptr.vmem [resolvable:$false] %s2735_s6 }
  0x5a   : > { %s2737_s8 = scalar_lea.vmem %s2736_s6, 6144  ;;  %p2738_p0 = scmp.lt.s32.totalorder %s3030_s25, %s2736_s6 }
  0x5b   : > { %p2733_p2 = pnand %p2731_p10, %p2717_p9  ;;  %p2739_p5 = scmp.lt.s32.totalorder %s2737_s8, %s2730_s24 }
  0x5d   : > { %p2734_p8 = pneg %p2733_p2  ;;  %p2740_p1 = por %p2739_p5, %p2738_p0 }
  0x5f   : > { %p2741_p6 = pnand %p2740_p1, %p2734_p8 }
  0x61   : > { %2744 = shalt.err (!%p2741_p6)
}
  0x62   : > { %s2844_s10 = smov 192   ;;  %s2845_s13 = smov 12  }
  0x63   : > { %2548 = dma.hbm_to_vmem [thread:$0]  (!%p2959_p4), %s3026_s5, 3072, %s3030_s25, %s3037_s7, %s2844_s10, %s2844_s10, %s2845_s13  }
  0x64   : > { %228 = sbr.rel (%p2941_p12) target bundleno = 671 (0x29f), region = 36  ;;  %p3326_p9 = scmp.eq.s32.totalorder (!%p2941_p12), %s2910_s3, 0 }
  0x6b   : > { %2798 = dma.done.wait (%p3326_p9), [#allocation5], 1024   ;;  %p3327_p13 = pmov %p3326_p9 }
  0x6c   : > { %p3328_p11 = pmov %p3326_p9 }
  0x6d   : > { %2800 = vsyncadd (%p3327_p13), [#allocation5], 4294966272 }
  0x6e   : > { %2802 = dma.done.wait (%p3328_p11), [#allocation8], 512   ;;  %p3329_p3 = pmov %p3326_p9 }
  0x6f   : > { %s238_s9 = sand.u32 1, %s2910_s3   ;;  %s3077_s5 = sand.u32 1, %s2819_s18  }
  0x70   : > { %2804 = vsyncadd (%p3329_p3), [#allocation8], 4294966784  ;;  %s2525_s29 = smul.u32 192, %s3077_s5  ;;  %s239_s25 = scalar_lea.sflag [#allocation5], %s238_s9 }
  0x71   : > { %p3330_p12 = scmp.ne.s32.totalorder %s3320_s26, 0 }
  0x72   : > { %s3080_s7 = scalar_lea.vmem [#allocation9], %s2525_s29 }
  0x73   : > { %2806 = dma.done.wait (%p3330_p12), %s239_s25, 3072  }
  0x74   : > { %2808 = vsyncadd (%p3330_p12), %s239_s25, 4294964224  ;;  %v2846_v0 = vmov 0   ;;  %v2619_v1 = vld [vmem:[%s3080_s7 + $0x4] ss:$12 sps:$4 sm:$0xff]   ;;  %v2621_v2 = vld [vmem:[%s3080_s7] ss:$12 sps:$4 sm:$0xff]  }
  0x75   : > { %526 = vmatprep.mubr.bf16.mxu0 %v2846_v0  ;;  %494 = vmatprep.subr.bf16.mxu0 %v2619_v1  ;;  %v2622_v3 = vld [vmem:[%s3080_s7 + $0x1c] ss:$12 sps:$4 sm:$0xff]   ;;  %v2624_v4 = vld [vmem:[%s3080_s7 + $0x18] ss:$12 sps:$4 sm:$0xff]   ;;  %v2626_v6 = vld [vmem:[%s3080_s7 + $0x34] ss:$12 sps:$4 sm:$0xff]  }
  0x76   : > { %495 = vmatpush1.bf16.msra.mxu0 %v2621_v2  ;;  %v2625_v5 = vld [vmem:[%s3080_s7 + $0x8] ss:$12 sps:$4 sm:$0xff]   ;;  %v2629_v7 = vld [vmem:[%s3080_s7 + $0x20] ss:$12 sps:$4 sm:$0xff]   ;;  %v2628_v8 = vld [vmem:[%s3080_s7 + $0x30] ss:$12 sps:$4 sm:$0xff]  }
  0x77   : > { %496 = vmatprep.subr.bf16.mxu0 %v2622_v3  ;;  %2251 = vmatprep.subr.bf16.mxu1 %v2625_v5  ;;  %v2630_v9 = vld [vmem:[%s3080_s7 + $0x4c] ss:$12 sps:$4 sm:$0xff]   ;;  %v2632_v11 = vld [vmem:[%s3080_s7 + $0x48] ss:$12 sps:$4 sm:$0xff]   ;;  %v2637_v12 = vld [vmem:[%s3080_s7 + $0x50] ss:$12 sps:$4 sm:$0xff]  }
  0x78   : > { %2252 = vmatpush3.bf16.msra.mxu1 %v2625_v5  ;;  %v2633_v10 = vld [vmem:[%s3080_s7 + $0x38] ss:$12 sps:$4 sm:$0xff]   ;;  %v2636_v14 = vld [vmem:[%s3080_s7 + $0x60] ss:$12 sps:$4 sm:$0xff]   ;;  %v2641_v15 = vld [vmem:[%s3080_s7 + $0x68] ss:$12 sps:$4 sm:$0xff]  }
  0x79   : > { %2253 = vmatprep.subr.bf16.mxu1 %v2629_v7  ;;  %v2634_v13 = vld [vmem:[%s3080_s7 + $0x64] ss:$12 sps:$4 sm:$0xff]   ;;  %v2638_v16 = vld [vmem:[%s3080_s7 + $0x7c] ss:$12 sps:$4 sm:$0xff]   ;;  %v2645_v19 = vld [vmem:[%s3080_s7 + $0x80] ss:$12 sps:$4 sm:$0xff]  }
  0x7a   : > { %497 = vmatpush1.bf16.msra.mxu0 %v2624_v4  ;;  %v2640_v17 = vld [vmem:[%s3080_s7 + $0x78] ss:$12 sps:$4 sm:$0xff]   ;;  %v2642_v20 = vld [vmem:[%s3080_s7 + $0x94] ss:$12 sps:$4 sm:$0xff]   ;;  %v2644_v21 = vld [vmem:[%s3080_s7 + $0x90] ss:$12 sps:$4 sm:$0xff]  }
  0x7b   : > { %498 = vmatprep.subr.bf16.mxu0 %v2626_v6  ;;  %v2650_v18 = vld [vmem:[#allocation4] sm:$0xff]   ;;  %v2646_v23 = vld [vmem:[%s3080_s7 + $0xac] ss:$12 sps:$4 sm:$0xff]   ;;  %v2648_v24 = vld [vmem:[%s3080_s7 + $0xa8] ss:$12 sps:$4 sm:$0xff]   ;;  %vm763_vm0 = vcmask 392192  }
  0x7c   : > { %2254 = vmatpush3.bf16.msra.mxu1 %v2629_v7  ;;  %2267 = vmatprep.mubr.bf16.mxu1 %v2650_v18  ;;  %v2649_v22 = vld [vmem:[%s3080_s7 + $0x98] ss:$12 sps:$4 sm:$0xff]   ;;  %v2651_v25 = vld [vmem:[%s3080_s7 + $0xb0] ss:$12 sps:$4 sm:$0xff]   ;;  %v2652_v26 = vld [vmem:[#allocation4 + $0x8] sm:$0xff]   ;;  %s756_s3 = sld [smem:[#allocation3]] }
  0x7d   : > { %2255 = vmatprep.subr.bf16.mxu1 %v2633_v10  ;;  %v2653_v27 = vld [vmem:[#allocation4 + $0x10] sm:$0xff]   ;;  %v2654_v28 = vld [vmem:[#allocation4 + $0x18] sm:$0xff]   ;;  %v2655_v29 = vld [vmem:[#allocation4 + $0x20] sm:$0xff]   ;;  %s1899_s26 = sshll.u32 %s3077_s5, 7  ;;  %s2025_s14 = sshll.u32 %s2827_s20, 6 }
  0x7e   : > { %499 = vmatpush1.bf16.msra.mxu0 %v2628_v8  ;;  %v2656_v30 = vld [vmem:[#allocation4 + $0x28] sm:$0xff]   ;;  %v2657_v31 = vld [vmem:[#allocation4 + $0x30] sm:$0xff]   ;;  %v2658_v32 = vld [vmem:[#allocation4 + $0x38] sm:$0xff]   ;;  %s3209_s15 = scalar_lea.vmem [#allocation10], %s1899_s26  ;;  %s3259_s11 = scalar_lea.hbm %s3315_s4, %s2025_s14 }
  0x7f   : > { %500 = vmatprep.subr.bf16.mxu0 %v2630_v9  ;;  %v3118_v33 = vld [vmem:[#allocation7] sm:$0xff]  ;;  %v3124_v55 = vld [vmem:[#allocation7 + $0x8] sm:$0xff]  ;;  %v3126_v58 = vld [vmem:[#allocation7 + $0x10] sm:$0xff]  ;;  %s1785_s16 = sshll.u32 %s3209_s15, 4  ;;  %s1770_s20 = scalar_lea.sflag [#allocation6], %s3077_s5  ;;  %s3261_s16 = int_to_ptr.vmem [resolvable:$true] %s1785_s16 }
  0x80   : > { %2256 = vmatpush3.bf16.msra.mxu1 %v2633_v10  ;;  %v3132_v63 = vld [vmem:[#allocation7 + $0x18] sm:$0xff]  ;;  %s2745_s6 = scalar_lea.vmem %s3261_s16, 2048  ;;  %p3331_p7 = scmp.ne.s32.totalorder %s3321_s27, 0 }
  0x81   : > { %2257 = vmatprep.subr.bf16.mxu1 %v2637_v12  ;;  %p2746_p4 = scmp.ne.s32.totalorder %s3261_s16, %s2745_s6  ;;  %s2847_s8 = smov [#allocation10]  }
  0x82   : > { %501 = vmatpush1.bf16.msra.mxu0 %v2632_v11  ;;  %s2749_s10 = sshll.u32 %s2847_s8, 4  ;;  %s2750_s10 = int_to_ptr.vmem [resolvable:$false] %s2749_s10 }
  0x83   : > { %502 = vmatprep.subr.bf16.mxu0 %v2634_v13  ;;  %p2747_p10 = pnand %p2746_p4, %p3331_p7  ;;  %s2751_s13 = scalar_lea.vmem %s2750_s10, 4096 }
  0x84   : > { %2258 = vmatpush3.bf16.msra.mxu1 %v2637_v12  ;;  %p2752_p8 = scmp.lt.s32.totalorder %s3261_s16, %s2750_s10  ;;  %p2753_p0 = scmp.lt.s32.totalorder %s2751_s13, %s2745_s6 }
  0x85   : > { %2259 = vmatprep.subr.bf16.mxu1 %v2641_v15  ;;  %p2748_p2 = pneg %p2747_p10 }
  0x86   : > { %503 = vmatpush1.bf16.msra.mxu0 %v2636_v14  ;;  %p2754_p5 = por %p2753_p0, %p2752_p8 }
  0x87   : > { %504 = vmatprep.subr.bf16.mxu0 %v2638_v16 }
  0x88   : > { %2260 = vmatpush3.bf16.msra.mxu1 %v2641_v15  ;;  %p2755_p1 = pnand %p2754_p5, %p2748_p2 }
  0x89   : > { %2261 = vmatprep.subr.bf16.mxu1 %v2645_v19 }
  0x8a   : > { %505 = vmatpush1.bf16.msra.mxu0 %v2640_v17 }
  0x8b   : > { %506 = vmatprep.subr.bf16.mxu0 %v2642_v20 }
  0x8c   : > { %2262 = vmatpush3.bf16.msra.mxu1 %v2645_v19 }
  0x8d   : > { %2263 = vmatprep.subr.bf16.mxu1 %v2649_v22 }
  0x8e   : > { %507 = vmatpush1.bf16.msra.mxu0 %v2644_v21 }
  0x8f   : > { %508 = vmatprep.subr.bf16.mxu0 %v2646_v23 }
  0x90   : > { %2264 = vmatpush3.bf16.msra.mxu1 %v2649_v22 }
  0x91   : > { %2265 = vmatprep.subr.bf16.mxu1 %v2651_v25 }
  0x92   : > { %509 = vmatpush1.bf16.msra.mxu0 %v2648_v24 }
  0x94   : > { %2266 = vmatpush3.bf16.msra.mxu1 %v2651_v25 }
  0x95   : > { %527 = vmatmul.mubr.bf16.vlgmr.msra.gmra.mrb[0].mxu0 %v2650_v18 }
  0x96   : > { %536 = vmatprep.mubr.bf16.mxu0 %v2846_v0 }
  0x97   : > { %2268 = vmatmul.mubr.bf16.vlgmr.msra.gmra.mrb[0].mxu1 %v2652_v26 }
  0x98   : > { %2271 = vmatprep.mubr.bf16.mxu1 %v2653_v27 }
  0x9d   : > { %537 = vmatmul.mubr.bf16.gmra.mrb[4].mxu0 %v2652_v26 }
  0x9e   : > { %546 = vmatprep.mubr.bf16.mxu0 %v2846_v0 }
  0x9f   : > { %2272 = vmatmul.mubr.bf16.gmra.mrb[4].mxu1 %v2654_v28 }
  0xa0   : > { %2275 = vmatprep.mubr.bf16.mxu1 %v2655_v29 }
  0xa5   : > { %547 = vmatmul.mubr.bf16.gmra.mrb[8].mxu0 %v2653_v27 }
  0xa6   : > { %556 = vmatprep.mubr.bf16.mxu0 %v2846_v0 }
  0xa7   : > { %2276 = vmatmul.mubr.bf16.gmra.mrb[8].mxu1 %v2656_v30 }
  0xa8   : > { %2279 = vmatprep.mubr.bf16.mxu1 %v2657_v31 }
  0xad   : > { %557 = vmatmul.mubr.bf16.gmra.mrb[12].mxu0 %v2654_v28 }
  0xae   : > { %566 = vmatprep.mubr.bf16.mxu0 %v2846_v0 }
  0xaf   : > { %2280 = vmatmul.mubr.bf16.gmra.mrb[12].mxu1 %v2658_v32 }
  0xb0   : > { %2295 = vmatprep.mubr.msk.f32.mxu1 %vm763_vm0, %v3118_v33 }
  0xb5   : > { %567 = vmatmul.mubr.bf16.gmra.mrb[16].mxu0 %v2655_v29 }
  0xb6   : > { %576 = vmatprep.mubr.bf16.mxu0 %v2846_v0 }
  0xbd   : > { %577 = vmatmul.mubr.bf16.gmra.mrb[20].mxu0 %v2656_v30 }
  0xbe   : > { %586 = vmatprep.mubr.bf16.mxu0 %v2846_v0 }
  0xc5   : > { %587 = vmatmul.mubr.bf16.gmra.mrb[24].mxu0 %v2657_v31 }
  0xc6   : > { %596 = vmatprep.mubr.bf16.mxu0 %v2846_v0 }
  0xcd   : > { %597 = vmatmul.mubr.bf16.gmra.mrb[28].mxu0 %v2658_v32 }
  0xce   : > { %2349 = vmatprep.mubr.msk.f32.mxu0 %vm763_vm0, %v3118_v33 }
 0x168   : > { %v528_v34 = vpop.f32.mrb[0].mxu0 }
 0x169   : > { %v530_v35 = vpop.f32.mrb[1].mxu0 }
 0x16a   : > { %v532_v36 = vpop.f32.mrb[2].mxu0  ;;  %v2269_v39 = vpop.f32.mrb[0].mxu1 }
 0x16b   : > { %v2427_v37 = vpack.c.bf16 %v532_v36, %v528_v34  ;;  %v534_v38 = vpop.f32.mrb[3].mxu0  ;;  %v641_v41 = vpop.f32.mrb[1].mxu1 }
 0x16c   : > { %v2431_v40 = vpack.c.bf16 %v534_v38, %v530_v35  ;;  %v2270_v42 = vpop.f32.mrb[2].mxu1 }
 0x16d   : > { %2428 = vmatprep.subr.bf16.mxu1 %v2427_v37  ;;  %v2447_v43 = vpack.c.bf16 %v2270_v42, %v2269_v39  ;;  %v644_v44 = vpop.f32.mrb[3].mxu1 }
 0x16e   : > { %2430 = vmatpush3.bf16.msra.mxu1 %v2427_v37  ;;  %v2435_v45 = vpack.c.bf16 %v644_v44, %v641_v41 }
 0x16f   : > { %2432 = vmatprep.subr.bf16.mxu1 %v2431_v40 }
 0x170   : > { %v538_v46 = vpop.f32.mrb[4].mxu0 }
 0x171   : > { %v540_v47 = vpop.f32.mrb[5].mxu0 }
 0x172   : > { %v542_v48 = vpop.f32.mrb[6].mxu0  ;;  %2434 = vmatpush3.bf16.msra.mxu1 %v2431_v40  ;;  %v2273_v51 = vpop.f32.mrb[4].mxu1 }
 0x173   : > { %v2439_v49 = vpack.c.bf16 %v542_v48, %v538_v46  ;;  %v544_v50 = vpop.f32.mrb[7].mxu0  ;;  %2436 = vmatprep.subr.bf16.mxu1 %v2435_v45  ;;  %v657_v53 = vpop.f32.mrb[5].mxu1 }
 0x174   : > { %v2443_v52 = vpack.c.bf16 %v544_v50, %v540_v47  ;;  %v2274_v54 = vpop.f32.mrb[6].mxu1 }
 0x175   : > { %v2471_v56 = vpack.c.bf16 %v2274_v54, %v2273_v51  ;;  %v660_v57 = vpop.f32.mrb[7].mxu1 }
 0x176   : > { %2438 = vmatpush3.bf16.msra.mxu1 %v2435_v45  ;;  %v2459_v59 = vpack.c.bf16 %v660_v57, %v657_v53 }
 0x177   : > { %2440 = vmatprep.subr.bf16.mxu1 %v2439_v49 }
 0x178   : > { %v548_v60 = vpop.f32.mrb[8].mxu0 }
 0x179   : > { %v550_v61 = vpop.f32.mrb[9].mxu0  ;;  %2296 = vmatmul.mubr.msk.f32.vlgmr.msra.gmra.mrb[16].mxu1 %vm763_vm0, %v3124_v55 }
 0x17a   : > { %v552_v62 = vpop.f32.mrb[10].mxu0  ;;  %2442 = vmatpush3.bf16.msra.mxu1 %v2439_v49  ;;  %2298 = vmatprep.mubr.msk.f32.mxu1 %vm763_vm0, %v3126_v58  ;;  %v2277_v2 = vpop.f32.mrb[8].mxu1 }
 0x17b   : > { %v2451_v0 = vpack.c.bf16 %v552_v62, %v548_v60  ;;  %v554_v1 = vpop.f32.mrb[11].mxu0  ;;  %2444 = vmatprep.subr.bf16.mxu1 %v2443_v52  ;;  %v673_v4 = vpop.f32.mrb[9].mxu1 }
 0x17c   : > { %v2455_v3 = vpack.c.bf16 %v554_v1, %v550_v61  ;;  %v2278_v5 = vpop.f32.mrb[10].mxu1 }
 0x17d   : > { %2299 = vmatmul.mubr.msk.f32.gmra.mrb[18].mxu1 %vm763_vm0, %v3132_v63  ;;  %v3138_v6 = vpack.c.bf16 %v2278_v5, %v2277_v2  ;;  %v676_v7 = vpop.f32.mrb[11].mxu1 }
 0x17e   : > { %2446 = vmatpush3.bf16.msra.mxu1 %v2443_v52  ;;  %2313 = vmatprep.mubr.msk.f32.mxu1 %vm763_vm0, %v3118_v33  ;;  %v2483_v8 = vpack.c.bf16 %v676_v7, %v673_v4 }
 0x17f   : > { %2448 = vmatprep.subr.bf16.mxu1 %v2447_v43 }
 0x180   : > { %v558_v9 = vpop.f32.mrb[12].mxu0 }
 0x181   : > { %v560_v10 = vpop.f32.mrb[13].mxu0 }
 0x182   : > { %v562_v11 = vpop.f32.mrb[14].mxu0  ;;  %2450 = vmatpush3.bf16.msra.mxu1 %v2447_v43  ;;  %v2281_v14 = vpop.f32.mrb[12].mxu1 }
 0x183   : > { %v2463_v12 = vpack.c.bf16 %v562_v11, %v558_v9  ;;  %v564_v13 = vpop.f32.mrb[15].mxu0  ;;  %2452 = vmatprep.subr.bf16.mxu1 %v2451_v0  ;;  %v689_v16 = vpop.f32.mrb[13].mxu1 }
 0x184   : > { %v2467_v15 = vpack.c.bf16 %v564_v13, %v560_v10  ;;  %v2282_v17 = vpop.f32.mrb[14].mxu1 }
 0x185   : > { %2464 = vmatprep.subr.bf16.mxu0 %v2463_v12  ;;  %2314 = vmatmul.mubr.msk.f32.vlgmr.msra.gmra.mrb[20].mxu1 %vm763_vm0, %v3124_v55  ;;  %v3142_v18 = vpack.c.bf16 %v2282_v17, %v2281_v14  ;;  %v692_v19 = vpop.f32.mrb[15].mxu1 }
 0x186   : > { %2454 = vmatpush3.bf16.msra.mxu1 %v2451_v0  ;;  %2466 = vmatpush3.bf16.msra.mxu0 %v2463_v12  ;;  %v3144_v20 = vpack.c.bf16 %v692_v19, %v689_v16 }
 0x187   : > { %2456 = vmatprep.subr.bf16.mxu1 %v2455_v3  ;;  %2468 = vmatprep.subr.bf16.mxu0 %v2467_v15 }
 0x188   : > { %v568_v21 = vpop.f32.mrb[16].mxu0  ;;  %2316 = vmatprep.mubr.msk.f32.mxu1 %vm763_vm0, %v3126_v58 }
 0x189   : > { %v570_v22 = vpop.f32.mrb[17].mxu0  ;;  %2317 = vmatmul.mubr.msk.f32.gmra.mrb[22].mxu1 %vm763_vm0, %v3132_v63 }
 0x18a   : > { %2458 = vmatpush3.bf16.msra.mxu1 %v2455_v3  ;;  %2470 = vmatpush3.bf16.msra.mxu0 %v2467_v15  ;;  %v572_v23 = vpop.f32.mrb[18].mxu0 }
 0x18b   : > { %2460 = vmatprep.subr.bf16.mxu1 %v2459_v59  ;;  %2472 = vmatprep.subr.bf16.mxu0 %v2471_v56  ;;  %v2475_v24 = vpack.c.bf16 %v572_v23, %v568_v21  ;;  %v574_v25 = vpop.f32.mrb[19].mxu0 }
 0x18c   : > { %2331 = vmatprep.mubr.msk.f32.mxu1 %vm763_vm0, %v3118_v33  ;;  %v2479_v26 = vpack.c.bf16 %v574_v25, %v570_v22 }
 0x18e   : > { %2462 = vmatpush3.bf16.msra.mxu1 %v2459_v59  ;;  %2474 = vmatpush3.bf16.msra.mxu0 %v2471_v56 }
 0x18f   : > { %2476 = vmatprep.subr.bf16.mxu1 %v2475_v24 }
 0x190   : > { %v578_v27 = vpop.f32.mrb[20].mxu0 }
 0x191   : > { %2332 = vmatmul.mubr.msk.f32.vlgmr.msra.gmra.mrb[24].mxu1 %vm763_vm0, %v3124_v55  ;;  %v580_v28 = vpop.f32.mrb[21].mxu0  ;;  %2350 = vmatmul.mubr.msk.f32.vlgmr.msra.gmra.mrb[32].mxu0 %vm763_vm0, %v3124_v55 }
 0x192   : > { %2478 = vmatpush3.bf16.msra.mxu1 %v2475_v24  ;;  %v582_v29 = vpop.f32.mrb[22].mxu0  ;;  %2334 = vmatprep.mubr.msk.f32.mxu1 %vm763_vm0, %v3126_v58 }
 0x193   : > { %2480 = vmatprep.subr.bf16.mxu1 %v2479_v26  ;;  %v2487_v30 = vpack.c.bf16 %v582_v29, %v578_v27  ;;  %v584_v31 = vpop.f32.mrb[23].mxu0  ;;  %2352 = vmatprep.mubr.msk.f32.mxu0 %vm763_vm0, %v3126_v58 }
 0x194   : > { %v2491_v32 = vpack.c.bf16 %v584_v31, %v580_v28 }
 0x195   : > { %2488 = vmatprep.subr.bf16.mxu0 %v2487_v30  ;;  %2335 = vmatmul.mubr.msk.f32.gmra.mrb[26].mxu1 %vm763_vm0, %v3132_v63 }
 0x196   : > { %2482 = vmatpush3.bf16.msra.mxu1 %v2479_v26  ;;  %2490 = vmatpush3.bf16.msra.mxu0 %v2487_v30 }
 0x197   : > { %2484 = vmatprep.subr.bf16.mxu1 %v2483_v8  ;;  %2492 = vmatprep.subr.bf16.mxu0 %v2491_v32 }
 0x198   : > { %v588_v34 = vpop.f32.mrb[24].mxu0  ;;  %2367 = vmatprep.mubr.msk.f32.mxu1 %vm763_vm0, %v3118_v33  ;;  %2353 = vmatmul.mubr.msk.f32.gmra.mrb[34].mxu0 %vm763_vm0, %v3132_v63 }
 0x199   : > { %v590_v35 = vpop.f32.mrb[25].mxu0  ;;  %2385 = vmatprep.mubr.msk.f32.mxu0 %vm763_vm0, %v3118_v33 }
 0x19a   : > { %v592_v36 = vpop.f32.mrb[26].mxu0  ;;  %2486 = vmatpush3.bf16.msra.mxu1 %v2483_v8  ;;  %2494 = vmatpush3.bf16.msra.mxu0 %v2491_v32 }
 0x19b   : > { %v2499_v37 = vpack.c.bf16 %v592_v36, %v588_v34  ;;  %v594_v38 = vpop.f32.mrb[27].mxu0  ;;  %2496 = vmatprep.subr.bf16.mxu0 %v3138_v6 }
 0x19c   : > { %v2503_v39 = vpack.c.bf16 %v594_v38, %v590_v35 }
 0x19d   : > { %2500 = vmatprep.subr.bf16.mxu1 %v2499_v37  ;;  %2368 = vmatmul.mubr.msk.f32.vlgmr.msra.gmra.mrb[28].mxu1 %vm763_vm0, %v3124_v55 }
 0x19e   : > { %2502 = vmatpush3.bf16.msra.mxu1 %v2499_v37  ;;  %2498 = vmatpush3.bf16.msra.mxu0 %v3138_v6 }
 0x19f   : > { %2504 = vmatprep.subr.bf16.mxu1 %v2503_v39  ;;  %2370 = vmatprep.mubr.msk.f32.mxu1 %vm763_vm0, %v3126_v58 }
 0x1a0   : > { %v598_v40 = vpop.f32.mrb[28].mxu0 }
 0x1a1   : > { %v600_v41 = vpop.f32.mrb[29].mxu0  ;;  %2386 = vmatmul.mubr.msk.f32.vlgmr.msra.gmra.mrb[36].mxu0 %vm763_vm0, %v3124_v55  ;;  %2371 = vmatmul.mubr.msk.f32.gmra.mrb[30].mxu1 %vm763_vm0, %v3132_v63 }
 0x1a2   : > { %v602_v42 = vpop.f32.mrb[30].mxu0  ;;  %2506 = vmatpush3.bf16.msra.mxu1 %v2503_v39  ;;  %2388 = vmatprep.mubr.msk.f32.mxu0 %vm763_vm0, %v3126_v58 }
 0x1a3   : > { %v2511_v43 = vpack.c.bf16 %v602_v42, %v598_v40  ;;  %v604_v44 = vpop.f32.mrb[31].mxu0  ;;  %2508 = vmatprep.subr.bf16.mxu1 %v3144_v20  ;;  %2403 = vmatprep.mubr.msk.f32.mxu1 %vm763_vm0, %v3118_v33 }
 0x1a4   : > { %v2515_v45 = vpack.c.bf16 %v604_v44, %v600_v41 }
 0x1a5   : > { %2512 = vmatprep.subr.bf16.mxu0 %v2511_v43  ;;  %2389 = vmatmul.mubr.msk.f32.gmra.mrb[38].mxu0 %vm763_vm0, %v3132_v63 }
 0x1a6   : > { %2514 = vmatpush3.bf16.msra.mxu0 %v2511_v43  ;;  %2510 = vmatpush3.bf16.msra.mxu1 %v3144_v20 }
 0x1a7   : > { %2516 = vmatprep.subr.bf16.mxu0 %v2515_v45  ;;  %2421 = vmatprep.mubr.msk.f32.mxu0 %vm763_vm0, %v3118_v33  ;;  %v3202_v33 = vstv %s756_s3 }
 0x1a9   : > { %2404 = vmatmul.mubr.msk.f32.vlgmr.msra.gmra.mrb[32].mxu1 %vm763_vm0, %v3124_v55 }
 0x1aa   : > { %2518 = vmatpush3.bf16.msra.mxu0 %v2515_v45  ;;  %2406 = vmatprep.mubr.msk.f32.mxu1 %vm763_vm0, %v3126_v58 }
 0x1ab   : > { %2520 = vmatprep.subr.bf16.mxu0 %v3142_v18 }
 0x1ad   : > { %2407 = vmatmul.mubr.msk.f32.gmra.mrb[34].mxu1 %vm763_vm0, %v3132_v63 }
 0x1ae   : > { %2522 = vmatpush3.bf16.msra.mxu0 %v3142_v18 }
 0x1b1   : > { %2422 = vmatmul.mubr.msk.f32.vlgmr.msra.gmra.mrb[40].mxu0 %vm763_vm0, %v3124_v55 }
 0x1b2   : > { %2424 = vmatprep.mubr.msk.f32.mxu0 %vm763_vm0, %v3126_v58 }
 0x1b5   : > { %2425 = vmatmul.mubr.msk.f32.gmra.mrb[42].mxu0 %vm763_vm0, %v3132_v63 }
 0x24c   : > { %v2297_v46 = vpop.f32.mrb[16].mxu1 }
 0x24d   : > { %vm862_vm1 = vcmp.gt.f32.partialorder %v2297_v46, 0.0  ;;  %v867_v47 = vmul.f32 %v2297_v46, %v3202_v33  ;;  %v842_v48 = vpop.f32.mrb[17].mxu1 }
 0x24e   : > { %vm861_vm2 = vcmp.gt.f32.partialorder %v842_v48, 0.0  ;;  %v866_v49 = vmul.f32 %v3202_v33, %v842_v48 }
 0x24f   : > { %v871_v50 = vsel %vm862_vm1, %v2297_v46, %v867_v47 }
 0x250   : > { %v870_v51 = vsel %vm861_vm2, %v842_v48, %v866_v49  ;;  %v2300_v52 = vpop.f32.mrb[18].mxu1 }
 0x251   : > { %v2063_v53 = vpack.c.bf16 %v871_v50, %v870_v51  ;;  %vm864_vm3 = vcmp.gt.f32.partialorder %v2300_v52, 0.0  ;;  %v869_v54 = vmul.f32 %v2300_v52, %v3202_v33  ;;  %v852_v55 = vpop.f32.mrb[19].mxu1 }
 0x252   : > { %vm863_vm4 = vcmp.gt.f32.partialorder %v852_v55, 0.0  ;;  %v868_v56 = vmul.f32 %v3202_v33, %v852_v55 }
 0x253   : > { %2064 = vst [vmem:[%s3209_s15] sm:$0xff] %v2063_v53   ;;  %v873_v57 = vsel %vm864_vm3, %v2300_v52, %v869_v54 }
 0x254   : > { %v872_v58 = vsel %vm863_vm4, %v852_v55, %v868_v56 }
 0x255   : > { %v2068_v59 = vpack.c.bf16 %v873_v57, %v872_v58 }
 0x257   : > { %2140 = vst [vmem:[%s3209_s15 + $0x8] sm:$0xff] %v2068_v59  }
 0x258   : > { %v2315_v60 = vpop.f32.mrb[20].mxu1 }
 0x259   : > { %vm987_vm5 = vcmp.gt.f32.partialorder %v2315_v60, 0.0  ;;  %v991_v61 = vmul.f32 %v2315_v60, %v3202_v33  ;;  %v967_v62 = vpop.f32.mrb[21].mxu1 }
 0x25a   : > { %vm986_vm6 = vcmp.gt.f32.partialorder %v967_v62, 0.0  ;;  %v990_v63 = vmul.f32 %v967_v62, %v3202_v33 }
 0x25b   : > { %v995_v0 = vsel %vm987_vm5, %v2315_v60, %v991_v61 }
 0x25c   : > { %v994_v1 = vsel %vm986_vm6, %v967_v62, %v990_v63  ;;  %v2318_v2 = vpop.f32.mrb[22].mxu1 }
 0x25d   : > { %v2073_v3 = vpack.c.bf16 %v995_v0, %v994_v1  ;;  %vm989_vm7 = vcmp.gt.f32.partialorder %v2318_v2, 0.0  ;;  %v993_v4 = vmul.f32 %v2318_v2, %v3202_v33  ;;  %v977_v5 = vpop.f32.mrb[23].mxu1 }
 0x25e   : > { %vm988_vm8 = vcmp.gt.f32.partialorder %v977_v5, 0.0  ;;  %v992_v6 = vmul.f32 %v977_v5, %v3202_v33 }
 0x25f   : > { %2141 = vst [vmem:[%s3209_s15 + $0x10] sm:$0xff] %v2073_v3   ;;  %v997_v7 = vsel %vm989_vm7, %v2318_v2, %v993_v4 }
 0x260   : > { %v996_v8 = vsel %vm988_vm8, %v977_v5, %v992_v6 }
 0x261   : > { %v2078_v9 = vpack.c.bf16 %v997_v7, %v996_v8 }
 0x263   : > { %2142 = vst [vmem:[%s3209_s15 + $0x18] sm:$0xff] %v2078_v9  }
 0x264   : > { %v2333_v10 = vpop.f32.mrb[24].mxu1  ;;  %v2351_v11 = vpop.f32.mrb[32].mxu0 }
 0x265   : > { %vm1112_vm9 = vcmp.gt.f32.partialorder %v2333_v10, 0.0  ;;  %v1116_v12 = vmul.f32 %v2333_v10, %v3202_v33  ;;  %vm1237_vm10 = vcmp.gt.f32.partialorder %v2351_v11, 0.0  ;;  %v1241_v13 = vmul.f32 %v2351_v11, %v3202_v33  ;;  %v1092_v14 = vpop.f32.mrb[25].mxu1  ;;  %v1217_v15 = vpop.f32.mrb[33].mxu0 }
 0x266   : > { %vm1111_vm11 = vcmp.gt.f32.partialorder %v1092_v14, 0.0  ;;  %v1115_v16 = vmul.f32 %v1092_v14, %v3202_v33  ;;  %vm1236_vm12 = vcmp.gt.f32.partialorder %v1217_v15, 0.0  ;;  %v1240_v17 = vmul.f32 %v1217_v15, %v3202_v33 }
 0x267   : > { %v1120_v18 = vsel %vm1112_vm9, %v2333_v10, %v1116_v12  ;;  %v1245_v19 = vsel %vm1237_vm10, %v2351_v11, %v1241_v13 }
 0x268   : > { %v1119_v20 = vsel %vm1111_vm11, %v1092_v14, %v1115_v16  ;;  %v1244_v21 = vsel %vm1236_vm12, %v1217_v15, %v1240_v17  ;;  %v2336_v22 = vpop.f32.mrb[26].mxu1 }
 0x269   : > { %v2083_v23 = vpack.c.bf16 %v1120_v18, %v1119_v20  ;;  %v2093_v24 = vpack.c.bf16 %v1245_v19, %v1244_v21  ;;  %vm1114_vm13 = vcmp.gt.f32.partialorder %v2336_v22, 0.0  ;;  %v1118_v25 = vmul.f32 %v2336_v22, %v3202_v33  ;;  %v1102_v26 = vpop.f32.mrb[27].mxu1 }
 0x26a   : > { %vm1113_vm14 = vcmp.gt.f32.partialorder %v1102_v26, 0.0  ;;  %v1117_v27 = vmul.f32 %v1102_v26, %v3202_v33 }
 0x26b   : > { %2143 = vst [vmem:[%s3209_s15 + $0x20] sm:$0xff] %v2083_v23   ;;  %2145 = vst [vmem:[%s3209_s15 + $0x30] sm:$0xff] %v2093_v24   ;;  %v1122_v28 = vsel %vm1114_vm13, %v2336_v22, %v1118_v25  ;;  %v2354_v29 = vpop.f32.mrb[34].mxu0 }
 0x26c   : > { %vm1239_vm15 = vcmp.gt.f32.partialorder %v2354_v29, 0.0  ;;  %v1243_v30 = vmul.f32 %v2354_v29, %v3202_v33  ;;  %v1121_v31 = vsel %vm1113_vm14, %v1102_v26, %v1117_v27  ;;  %v1227_v32 = vpop.f32.mrb[35].mxu0 }
 0x26d   : > { %v2088_v34 = vpack.c.bf16 %v1122_v28, %v1121_v31  ;;  %vm1238_vm0 = vcmp.gt.f32.partialorder %v1227_v32, 0.0  ;;  %v1242_v35 = vmul.f32 %v1227_v32, %v3202_v33 }
 0x26e   : > { %v1247_v36 = vsel %vm1239_vm15, %v2354_v29, %v1243_v30 }
 0x26f   : > { %2144 = vst [vmem:[%s3209_s15 + $0x28] sm:$0xff] %v2088_v34   ;;  %v1246_v37 = vsel %vm1238_vm0, %v1227_v32, %v1242_v35 }
 0x270   : > { %v2098_v38 = vpack.c.bf16 %v1247_v36, %v1246_v37  ;;  %v2369_v39 = vpop.f32.mrb[28].mxu1 }
 0x271   : > { %vm1362_vm1 = vcmp.gt.f32.partialorder %v2369_v39, 0.0  ;;  %v1366_v40 = vmul.f32 %v2369_v39, %v3202_v33  ;;  %v1342_v41 = vpop.f32.mrb[29].mxu1 }
 0x272   : > { %2146 = vst [vmem:[%s3209_s15 + $0x38] sm:$0xff] %v2098_v38   ;;  %vm1361_vm2 = vcmp.gt.f32.partialorder %v1342_v41, 0.0  ;;  %v1365_v42 = vmul.f32 %v1342_v41, %v3202_v33 }
 0x273   : > { %v1370_v43 = vsel %vm1362_vm1, %v2369_v39, %v1366_v40 }
 0x274   : > { %v2387_v44 = vpop.f32.mrb[36].mxu0  ;;  %v1369_v45 = vsel %vm1361_vm2, %v1342_v41, %v1365_v42  ;;  %v2372_v46 = vpop.f32.mrb[30].mxu1 }
 0x275   : > { %vm1487_vm3 = vcmp.gt.f32.partialorder %v2387_v44, 0.0  ;;  %v1491_v47 = vmul.f32 %v2387_v44, %v3202_v33  ;;  %v2103_v48 = vpack.c.bf16 %v1370_v43, %v1369_v45  ;;  %v1467_v49 = vpop.f32.mrb[37].mxu0  ;;  %vm1364_vm4 = vcmp.gt.f32.partialorder %v2372_v46, 0.0  ;;  %v1352_v50 = vpop.f32.mrb[31].mxu1 }
 0x276   : > { %vm1486_vm5 = vcmp.gt.f32.partialorder %v1467_v49, 0.0  ;;  %v1490_v51 = vmul.f32 %v1467_v49, %v3202_v33  ;;  %v1368_v52 = vmul.f32 %v2372_v46, %v3202_v33  ;;  %vm1363_vm6 = vcmp.gt.f32.partialorder %v1352_v50, 0.0 }
 0x277   : > { %v1495_v53 = vsel %vm1487_vm3, %v2387_v44, %v1491_v47  ;;  %2147 = vst [vmem:[%s3209_s15 + $0x40] sm:$0xff] %v2103_v48   ;;  %v1367_v54 = vmul.f32 %v1352_v50, %v3202_v33 }
 0x278   : > { %v1494_v55 = vsel %vm1486_vm5, %v1467_v49, %v1490_v51  ;;  %v1372_v56 = vsel %vm1364_vm4, %v2372_v46, %v1368_v52  ;;  %v2390_v57 = vpop.f32.mrb[38].mxu0 }
 0x279   : > { %v2113_v58 = vpack.c.bf16 %v1495_v53, %v1494_v55  ;;  %vm1489_vm7 = vcmp.gt.f32.partialorder %v2390_v57, 0.0  ;;  %v1493_v59 = vmul.f32 %v2390_v57, %v3202_v33  ;;  %v1371_v60 = vsel %vm1363_vm6, %v1352_v50, %v1367_v54  ;;  %v1477_v61 = vpop.f32.mrb[39].mxu0 }
 0x27a   : > { %v2108_v62 = vpack.c.bf16 %v1372_v56, %v1371_v60  ;;  %vm1488_vm8 = vcmp.gt.f32.partialorder %v1477_v61, 0.0  ;;  %v1492_v63 = vmul.f32 %v1477_v61, %v3202_v33 }
 0x27b   : > { %2149 = vst [vmem:[%s3209_s15 + $0x50] sm:$0xff] %v2113_v58   ;;  %v1497_v0 = vsel %vm1489_vm7, %v2390_v57, %v1493_v59 }
 0x27c   : > { %2148 = vst [vmem:[%s3209_s15 + $0x48] sm:$0xff] %v2108_v62   ;;  %v1496_v1 = vsel %vm1488_vm8, %v1477_v61, %v1492_v63  ;;  %v2405_v2 = vpop.f32.mrb[32].mxu1 }
 0x27d   : > { %v2118_v3 = vpack.c.bf16 %v1497_v0, %v1496_v1  ;;  %vm1612_vm9 = vcmp.gt.f32.partialorder %v2405_v2, 0.0  ;;  %v1616_v4 = vmul.f32 %v2405_v2, %v3202_v33  ;;  %v1592_v5 = vpop.f32.mrb[33].mxu1 }
 0x27e   : > { %vm1611_vm10 = vcmp.gt.f32.partialorder %v1592_v5, 0.0  ;;  %v1615_v6 = vmul.f32 %v1592_v5, %v3202_v33 }
 0x27f   : > { %2150 = vst [vmem:[%s3209_s15 + $0x58] sm:$0xff] %v2118_v3   ;;  %v1620_v7 = vsel %vm1612_vm9, %v2405_v2, %v1616_v4 }
 0x280   : > { %v1619_v8 = vsel %vm1611_vm10, %v1592_v5, %v1615_v6  ;;  %v2408_v9 = vpop.f32.mrb[34].mxu1 }
 0x281   : > { %v2123_v10 = vpack.c.bf16 %v1620_v7, %v1619_v8  ;;  %vm1614_vm11 = vcmp.gt.f32.partialorder %v2408_v9, 0.0  ;;  %v1618_v11 = vmul.f32 %v2408_v9, %v3202_v33  ;;  %v1602_v12 = vpop.f32.mrb[35].mxu1 }
 0x282   : > { %vm1613_vm12 = vcmp.gt.f32.partialorder %v1602_v12, 0.0  ;;  %v1617_v13 = vmul.f32 %v1602_v12, %v3202_v33 }
 0x283   : > { %2151 = vst [vmem:[%s3209_s15 + $0x60] sm:$0xff] %v2123_v10   ;;  %v1622_v14 = vsel %vm1614_vm11, %v2408_v9, %v1618_v11 }
 0x284   : > { %v2423_v15 = vpop.f32.mrb[40].mxu0  ;;  %v1621_v16 = vsel %vm1613_vm12, %v1602_v12, %v1617_v13 }
 0x285   : > { %vm1737_vm13 = vcmp.gt.f32.partialorder %v2423_v15, 0.0  ;;  %v1741_v17 = vmul.f32 %v2423_v15, %v3202_v33  ;;  %v1717_v18 = vpop.f32.mrb[41].mxu0  ;;  %v2128_v19 = vpack.c.bf16 %v1622_v14, %v1621_v16 }
 0x286   : > { %vm1736_vm14 = vcmp.gt.f32.partialorder %v1717_v18, 0.0  ;;  %v1740_v20 = vmul.f32 %v1717_v18, %v3202_v33 }
 0x287   : > { %v1745_v21 = vsel %vm1737_vm13, %v2423_v15, %v1741_v17  ;;  %2152 = vst [vmem:[%s3209_s15 + $0x68] sm:$0xff] %v2128_v19  }
 0x288   : > { %v1744_v22 = vsel %vm1736_vm14, %v1717_v18, %v1740_v20  ;;  %v2426_v23 = vpop.f32.mrb[42].mxu0 }
 0x289   : > { %v2133_v24 = vpack.c.bf16 %v1745_v21, %v1744_v22  ;;  %vm1739_vm15 = vcmp.gt.f32.partialorder %v2426_v23, 0.0  ;;  %v1743_v25 = vmul.f32 %v2426_v23, %v3202_v33  ;;  %v1727_v26 = vpop.f32.mrb[43].mxu0 }
 0x28a   : > { %vm1738_vm0 = vcmp.gt.f32.partialorder %v1727_v26, 0.0  ;;  %v1742_v27 = vmul.f32 %v1727_v26, %v3202_v33 }
 0x28b   : > { %2153 = vst [vmem:[%s3209_s15 + $0x70] sm:$0xff] %v2133_v24   ;;  %v1747_v28 = vsel %vm1739_vm15, %v2426_v23, %v1743_v25 }
 0x28c   : > { %v1746_v29 = vsel %vm1738_vm0, %v1727_v26, %v1742_v27 }
 0x28d   : > { %v2138_v30 = vpack.c.bf16 %v1747_v28, %v1746_v29 }
 0x28f   : > { %2154 = vst [vmem:[%s3209_s15 + $0x78] sm:$0xff] %v2138_v30  }
 0x290   : > { %2758 = shalt.err (!%p2755_p1)
}
 0x291   : > { %s2759_s9 = scalar_lea.hbm %s3259_s11, 2048  ;;  %s2763_s7 = scalar_lea.hbm %s3315_s4, 4096 }
 0x292   : > { %p2760_p6 = scmp.ne.s32.totalorder %s3259_s11, %s2759_s9  ;;  %p2764_p11 = scmp.lt.u32.totalorder %s3259_s11, %s3315_s4 }
 0x293   : > { %p2765_p3 = scmp.lt.u32.totalorder %s2763_s7, %s2759_s9  ;;  %p2767_p4 = scmp.lt.u32.totalorder %s2759_s9, %s3259_s11 }
 0x294   : > { %p2761_p9 = pnand %p2760_p6, %p3331_p7 }
 0x295   : > { %p2766_p12 = por %p2765_p3, %p2764_p11 }
 0x296   : > { %p2762_p13 = pneg %p2761_p9 }
 0x297   : > { %p2768_p10 = por %p2767_p4, %p2766_p12 }
 0x299   : > { %p2769_p2 = pnand %p2768_p10, %p2762_p13 }
 0x29b   : > { %2772 = shalt.err (!%p2769_p2)
}
 0x29c   : > { %s2848_s15 = smov 64   ;;  %s2849_s14 = smov 128  }
 0x29d   : > { %s2850_s23 = smov 4  }
 0x29e   : > { %2536 = dma.vmem_to_hbm [thread:$0]  (%p3331_p7), %s3261_s16, 2048, %s3259_s11, %s1770_s20, %s2848_s15, %s2849_s14, %s2850_s23  }
 0x29f PF: > { %s1800_s24 = sand.u32 1, %s2815_s17   ;;  %p3332_p8 = scmp.ne.s32.totalorder %s3322_s28, 0 }
 0x2a0   : > { %p3333_p0 = scmp.ge.s32.totalorder %s2835_s22, 2  ;;  %s1801_s6 = scalar_lea.sflag [#allocation6], %s1800_s24 }
 0x2a2   : > { %p2550_p5 = pnand %p3333_p0, %p3332_p8 }
 0x2a4   : > { %2810 = dma.done.wait (!%p2550_p5), %s1801_s6, 2048  }
 0x2a5   : > { %2812 = vsyncadd (!%p2550_p5), %s1801_s6, 4294965248  ;;  %s20_s22 = sadd.s32 1, %s2835_s22   ;;  %s3334_s17 = smov %s2819_s18 }
 0x2a6   : > { %p17_p1 = scmp.ge.s32.totalorder %s20_s22, 4   ;;  %s3335_s18 = smov %s2823_s19 }
 0x2a7   : > { %s3336_s19 = smov %s3035_s30  ;;  %s3337_s20 = smov %s2831_s21 }
 0x2a8   : > { %s3338_s21 = smov %s3340_s12  ;;  %19 = sbr.rel (!%p17_p1) target bundleno = 8 (0x8), region = 103 }
 0x2af   :  { %1806 = vsyncpa [#allocation5], 1 }
 0x2b0   :  { %1808 = vsyncpa [#allocation5 + $0x1], 1 }
 0x2b1   :  { %1809 = vsyncpa [#allocation8], 1 }
 0x2b2   :  { %1810 = vsyncpa [#allocation6], 1 }
 0x2b3   :  { %1812 = vsyncpa [#allocation6 + $0x1], 1 }

</bundles_post_ra>
